<compile_context>
chip_gen: v7x
topology: tpu7x:2x2x1
jax: 0.10.0
libtpu: 0.0.40
codegen_flags: <defaults>
</compile_context>

<pallas_src>
from collections import namedtuple

import jax
import jax.numpy as jnp
from jax.experimental import pallas as pl
from jax.experimental.pallas import tpu as pltpu

# Mimics the HF-style `outputs` object the torch module consumes.
ModelOutputs = namedtuple(
    "ModelOutputs", ["last_hidden_state", "pooler_output", "hidden_states"]
)


# ---------------------------------------------------------------------------
# VMEM budgeting / tile selection
# ---------------------------------------------------------------------------
def _vmem_capacity_bytes():
    """Physical VMEM per TensorCore; conservative fallback if unqueryable."""
    try:
        info = pltpu.get_tpu_info()
        for attr in ("vmem_capacity_bytes", "vmem_bytes"):
            cap = getattr(info, attr, None)
            if cap:
                return int(cap)
    except Exception:
        pass
    return 64 << 20  # v7x-sized fallback (safe lower bound on all generations)


def _pick_batch_tile(B):
    # tb is the sublane dim of the (tb, H) output block -> multiple of 8 or B.
    # Prefer >=2 batch tiles so v7x megacore can shard the "parallel" axis.
    if B <= 8 or B % 8 != 0:
        return B
    if B >= 32 and B % 16 == 0:
        return 16
    return 8
    # TODO(synk): when B <= 8 there is a single "parallel" tile; splitting the
    # seq axis across cores with a combine step could use both v7x TCs.


def _pick_seq_tile(S, tb, H, itemsize, n_hidden, budget):
    """Largest seq tile (S or a 128-multiple divisor of S) fitting the budget."""
    def hidden_bytes(t):
        return n_hidden * 2 * tb * t * H * itemsize  # 2x = double buffering

    candidates = [S] + [c for c in (1024, 512, 256, 128) if c < S and S % c == 0]
    for c in candidates:
        if hidden_bytes(c) <= budget:
            return c
    return candidates[-1]


def _vmem_limit_bytes(tb, ts, H, n_hidden, h_itemsize, cap):
    hidden = n_hidden * 2 * tb * ts * H * h_itemsize   # double-buffered inputs
    mask = 2 * tb * ts * 4
    invd = 2 * tb * 4
    out = 2 * tb * H * h_itemsize
    acc = tb * H * 4
    total = hidden + mask + invd + out + acc
    # 2x headroom for compiler-internal scratch, capped at 85% of physical VMEM.
    return int(min(max(2 * total, 16 << 20), int(cap * 0.85), 112 << 20))


def _pad_seq_to(attention_mask, hiddens, multiple):
    """Zero-pad the seq axis (mask=0 rows), which is exact for masked averaging."""
    S = hiddens[0].shape[1]
    pad = (-S) % multiple
    if pad:
        attention_mask = jnp.pad(attention_mask, ((0, 0), (0, pad)))
        hiddens = tuple(jnp.pad(h, ((0, 0), (0, pad), (0, 0))) for h in hiddens)
    return attention_mask, hiddens


# ---------------------------------------------------------------------------
# Kernels (VPU masked-multiply + sublane reduce; f32 accumulation)
# ---------------------------------------------------------------------------
def _masked_avg_kernel(mask_ref, invd_ref, h_ref, o_ref, acc_ref):
    sk = pl.program_id(1)

    @pl.when(sk == 0)
    def _init():
        acc_ref[...] = jnp.zeros_like(acc_ref)

    m = mask_ref[...]                            # (tb, ts, 1) f32, 0/1
    h = h_ref[...].astype(jnp.float32)           # (tb, ts, H)
    acc_ref[...] += jnp.sum(h * m, axis=1)       # lane-broadcast mul + sublane reduce

    @pl.when(sk == pl.num_programs(1) - 1)
    def _finalize():
        o_ref[...] = (acc_ref[...] * invd_ref[...]).astype(o_ref.dtype)


def _masked_avg2_kernel(mask_ref, invd_ref, h1_ref, h2_ref, o_ref, acc_ref):
    sk = pl.program_id(1)

    @pl.when(sk == 0)
    def _init():
        acc_ref[...] = jnp.zeros_like(acc_ref)

    m = mask_ref[...]                            # (tb, ts, 1)
    h = h1_ref[...].astype(jnp.float32) + h2_ref[...].astype(jnp.float32)
    acc_ref[...] += jnp.sum(h * m, axis=1)       # single masked reduce for both streams

    @pl.when(sk == pl.num_programs(1) - 1)
    def _finalize():
        o_ref[...] = (acc_ref[...] * (0.5 * invd_ref[...])).astype(o_ref.dtype)


# ---------------------------------------------------------------------------
# Wrappers
# ---------------------------------------------------------------------------
def _cls_pool(last_hidden):
    # Pure slice: the XLA slice is already optimal (a Pallas kernel here would
    # only add a sublane DMA over-read and a kernel launch) — per perf review.
    return last_hidden[:, 0, :]


def _masked_avg_pool(attention_mask, hiddens, *, batch_tile=None, seq_tile=None):
    """Masked mean over seq of the average of 1 or 2 [B,S,H] hidden states."""
    n_h = len(hiddens)
    attention_mask = attention_mask.astype(jnp.float32)

    # Keep the tiled path for long, awkward sequence lengths.
    S0 = hiddens[0].shape[1]
    if S0 > 512 and S0 % 128 != 0:
        attention_mask, hiddens = _pad_seq_to(attention_mask, hiddens, 128)

    h0 = hiddens[0]
    B, S, H = h0.shape
    dtype = h0.dtype

    cap = _vmem_capacity_bytes()
    budget = min(cap * 3 // 8, 56 << 20)
    tb = batch_tile if batch_tile is not None else _pick_batch_tile(B)
    ts = seq_tile if seq_tile is not None else _pick_seq_tile(
        S, tb, H, dtype.itemsize, n_h, budget)

    # Guard (only reachable with user-supplied seq_tile): keep exact tiling so
    # out-of-bounds blocks never contaminate the masked sum.
    if S % ts != 0:
        attention_mask, hiddens = _pad_seq_to(attention_mask, hiddens, ts)
        S = hiddens[0].shape[1]

    mask3 = attention_mask[:, :, None]                              # (B, S, 1)
    # Note: an all-zero mask row yields inf/NaN, matching the torch reference.
    inv_den = 1.0 / jnp.sum(attention_mask, axis=-1, keepdims=True)  # (B, 1)

    h_spec = pl.BlockSpec((tb, ts, H), lambda i, k: (i, k, 0))
    in_specs = [
        pl.BlockSpec((tb, ts, 1), lambda i, k: (i, k, 0)),          # mask
        pl.BlockSpec((tb, 1), lambda i, k: (i, 0)),                 # 1/mask.sum
    ] + [h_spec] * n_h

    kernel = _masked_avg_kernel if n_h == 1 else _masked_avg2_kernel

    return pl.pallas_call(
        kernel,
        out_shape=jax.ShapeDtypeStruct((B, H), dtype),
        grid_spec=pltpu.PrefetchScalarGridSpec(
            num_scalar_prefetch=0,
            grid=(pl.cdiv(B, tb), pl.cdiv(S, ts)),
            in_specs=in_specs,
            out_specs=pl.BlockSpec((tb, H), lambda i, k: (i, 0)),
            scratch_shapes=[pltpu.VMEM((tb, H), jnp.float32)],
        ),
        compiler_params=pltpu.CompilerParams(
            dimension_semantics=("parallel", "arbitrary"),
            vmem_limit_bytes=_vmem_limit_bytes(tb, ts, H, n_h, dtype.itemsize, cap),
        ),
    )(mask3, inv_den, *hiddens)


class Pooler:
    """JAX/Pallas port of simcse Pooler (parameter-free)."""

    def __init__(self, pooler_type):
        assert pooler_type in [
            "cls", "cls_before_pooler", "avg", "avg_top2", "avg_first_last"
        ], "unrecognized pooling type %s" % pooler_type
        self.pooler_type = pooler_type

    def __call__(self, attention_mask, outputs):
        last_hidden = outputs.last_hidden_state
        hidden_states = outputs.hidden_states
        if self.pooler_type in ("cls_before_pooler", "cls"):
            return _cls_pool(last_hidden)
        elif self.pooler_type == "avg":
            return _masked_avg_pool(attention_mask, (last_hidden,))
        elif self.pooler_type == "avg_first_last":
            return _masked_avg_pool(
                attention_mask, (hidden_states[0], hidden_states[-1]))
        elif self.pooler_type == "avg_top2":
            return _masked_avg_pool(
                attention_mask, (hidden_states[-2], hidden_states[-1]))
        else:
            raise NotImplementedError


# ---------------------------------------------------------------------------
# Pure-JAX reference (mirrors the torch forward exactly) for verification.
# ---------------------------------------------------------------------------
def _ref_pooler(pooler_type, attention_mask, outputs):
    last_hidden = outputs.last_hidden_state
    hidden_states = outputs.hidden_states
    m = attention_mask
    if pooler_type in ("cls_before_pooler", "cls"):
        return last_hidden[:, 0]
    if pooler_type == "avg":
        return (last_hidden * m[..., None]).sum(1) / m.sum(-1)[..., None]
    if pooler_type == "avg_first_last":
        h = (hidden_states[0] + hidden_states[-1]) / 2.0
        return (h * m[..., None]).sum(1) / m.sum(-1)[..., None]
    if pooler_type == "avg_top2":
        h = (hidden_states[-2] + hidden_states[-1]) / 2.0
        return (h * m[..., None]).sum(1) / m.sum(-1)[..., None]
    raise NotImplementedError


if __name__ == "__main__":
    def _make_outputs(key, B, S, H, n_layers):
        keys = jax.random.split(key, n_layers + 2)
        hidden_states = tuple(
            jax.random.normal(keys[i], (B, S, H), dtype=jnp.float32)
            for i in range(n_layers)
        )
        last_hidden = hidden_states[-1]
        pooler_output = jax.random.normal(keys[n_layers], (B, H), dtype=jnp.float32)
        lengths = jax.random.randint(keys[n_layers + 1], (B,), 1, S + 1)
        attention_mask = (
            jnp.arange(S)[None, :] < lengths[:, None]).astype(jnp.float32)
        return attention_mask, ModelOutputs(last_hidden, pooler_output, hidden_states)

    def _check(out, ref):
        assert out.shape == ref.shape, (out.shape, ref.shape)
        err = float(jnp.max(jnp.abs(out - ref)))
        assert jnp.allclose(out, ref, atol=1e-4, rtol=1e-4), err

    key = jax.random.PRNGKey(0)
    k1, k2 = jax.random.split(key)

    # Small single-tile case: all pooler types.
    mask_s, outs_s = _make_outputs(k1, 2, 8, 32, 3)
    for ptype in ["cls", "cls_before_pooler", "avg", "avg_top2", "avg_first_last"]:
        out = jax.block_until_ready(Pooler(ptype)(mask_s, outs_s))
        _check(out, _ref_pooler(ptype, mask_s, outs_s))

    # Multi batch-tile case (B=16 -> tb=8: two "parallel" tiles).
    mask_m, outs_m = _make_outputs(k2, 16, 256, 128, 3)
    for ptype in ["avg", "avg_top2", "avg_first_last"]:
        out = jax.block_until_ready(Pooler(ptype)(mask_m, outs_m))
        _check(out, _ref_pooler(ptype, mask_m, outs_m))

    # Force multiple sequence tiles to exercise the cross-tile accumulator path.
    out = jax.block_until_ready(_masked_avg_pool(
        mask_m, (outs_m.last_hidden_state,), batch_tile=8, seq_tile=128))
    _check(out, _ref_pooler("avg", mask_m, outs_m))
    out = jax.block_until_ready(_masked_avg_pool(
        mask_m, (outs_m.hidden_states[0], outs_m.hidden_states[-1]),
        batch_tile=8, seq_tile=128))
    _check(out, _ref_pooler("avg_first_last", mask_m, outs_m))

    print("KERNEL_OK")
</pallas_src>

<mosaic_0001>
module attributes {stable_mosaic.version = 11 : i64} {
  func.func @_masked_avg_kernel(%arg0: i32, %arg1: i32, %arg2: memref<2x8x1xf32, #tpu.memory_space<vmem>>, %arg3: memref<2x1xf32, #tpu.memory_space<vmem>>, %arg4: memref<2x8x32xf32, #tpu.memory_space<vmem>>, %arg5: memref<2x32xf32, #tpu.memory_space<vmem>>, %arg6: memref<2x32xf32, #tpu.memory_space<vmem>>) attributes {dimension_semantics = [#tpu.dimension_semantics<parallel>, #tpu.dimension_semantics<arbitrary>], iteration_bounds = array<i64: 1, 1>, scalar_prefetch = 0 : i64, scratch_operands = 1 : i64, tpu.core_type = #tpu.core_type<tc>, window_params = [{transform_indices = @transform_0, window_bounds = array<i64: 2, 8, 1>}, {transform_indices = @transform_1, window_bounds = array<i64: 2, 1>}, {transform_indices = @transform_2, window_bounds = array<i64: 2, 8, 32>}, {transform_indices = @transform_3, window_bounds = array<i64: 2, 32>}]} {
    %c0_i32 = arith.constant 0 : i32
    %0 = arith.cmpi eq, %arg1, %c0_i32 : i32
    %1 = arith.extui %0 : i1 to i32
    %c0_i32_0 = arith.constant 0 : i32
    %2 = arith.cmpi ne, %1, %c0_i32_0 : i32
    scf.if %2 {
      %cst_12 = arith.constant 0.000000e+00 : f32
      %14 = vector.broadcast %cst_12 : f32 to vector<2x32xf32>
      %c0_13 = arith.constant 0 : index
      %c0_14 = arith.constant 0 : index
      %15 = vector.load %arg6[%c0_13, %c0_14] : memref<2x32xf32, #tpu.memory_space<vmem>>, vector<2x32xf32>
      tpu.vector_store %arg6[%c0_13, %c0_14], %14 {strides = array<i32>} : memref<2x32xf32, #tpu.memory_space<vmem>>, vector<2x32xf32>,
    } else {
    }
    %c0 = arith.constant 0 : index
    %c0_1 = arith.constant 0 : index
    %c0_2 = arith.constant 0 : index
    %3 = vector.load %arg2[%c0, %c0_1, %c0_2] : memref<2x8x1xf32, #tpu.memory_space<vmem>>, vector<2x8x1xf32>
    %c0_3 = arith.constant 0 : index
    %c0_4 = arith.constant 0 : index
    %c0_5 = arith.constant 0 : index
    %4 = vector.load %arg4[%c0_3, %c0_4, %c0_5] : memref<2x8x32xf32, #tpu.memory_space<vmem>>, vector<2x8x32xf32>
    %c0_6 = arith.constant 0 : index
    %c0_7 = arith.constant 0 : index
    %5 = vector.load %arg6[%c0_6, %c0_7] : memref<2x32xf32, #tpu.memory_space<vmem>>, vector<2x32xf32>
    %6 = vector.broadcast %3 : vector<2x8x1xf32> to vector<2x8x32xf32>
    %7 = arith.mulf %4, %6 : vector<2x8x32xf32>
    %cst = arith.constant dense<0.000000e+00> : vector<2x32xf32>
    %8 = vector.multi_reduction <add>, %7, %cst [1] : vector<2x8x32xf32> to vector<2x32xf32>
    %9 = arith.addf %5, %8 : vector<2x32xf32>
    %c0_8 = arith.constant 0 : index
    %c0_9 = arith.constant 0 : index
    %10 = vector.load %arg6[%c0_8, %c0_9] : memref<2x32xf32, #tpu.memory_space<vmem>>, vector<2x32xf32>
    tpu.vector_store %arg6[%c0_8, %c0_9], %9 {strides = array<i32>} : memref<2x32xf32, #tpu.memory_space<vmem>>, vector<2x32xf32>,
    %c0_i32_10 = arith.constant 0 : i32
    %11 = arith.cmpi eq, %arg1, %c0_i32_10 : i32
    %12 = arith.extui %11 : i1 to i32
    %c0_i32_11 = arith.constant 0 : i32
    %13 = arith.cmpi ne, %12, %c0_i32_11 : i32
    scf.if %13 {
      %c0_12 = arith.constant 0 : index
      %c0_13 = arith.constant 0 : index
      %14 = vector.load %arg6[%c0_12, %c0_13] : memref<2x32xf32, #tpu.memory_space<vmem>>, vector<2x32xf32>
      %c0_14 = arith.constant 0 : index
      %c0_15 = arith.constant 0 : index
      %15 = vector.load %arg3[%c0_14, %c0_15] : memref<2x1xf32, #tpu.memory_space<vmem>>, vector<2x1xf32>
      %16 = vector.broadcast %15 : vector<2x1xf32> to vector<2x32xf32>
      %17 = arith.mulf %14, %16 : vector<2x32xf32>
      %c0_16 = arith.constant 0 : index
      %c0_17 = arith.constant 0 : index
      %18 = vector.load %arg5[%c0_16, %c0_17] : memref<2x32xf32, #tpu.memory_space<vmem>>, vector<2x32xf32>
      tpu.vector_store %arg5[%c0_16, %c0_17], %17 {strides = array<i32>} : memref<2x32xf32, #tpu.memory_space<vmem>>, vector<2x32xf32>,
    } else {
    }
    return
  }
  func.func @transform_0(%arg0: i32, %arg1: i32) -> (i32, i32, i32) {
    %c0_i32 = arith.constant 0 : i32
    %c0_i32_0 = arith.constant 0 : i32
    return %arg0, %arg1, %c0_i32 : i32, i32, i32
  }
  func.func @transform_1(%arg0: i32, %arg1: i32) -> (i32, i32) {
    %c0_i32 = arith.constant 0 : i32
    %c0_i32_0 = arith.constant 0 : i32
    return %arg0, %c0_i32 : i32, i32
  }
  func.func @transform_2(%arg0: i32, %arg1: i32) -> (i32, i32, i32) {
    %c0_i32 = arith.constant 0 : i32
    %c0_i32_0 = arith.constant 0 : i32
    return %arg0, %arg1, %c0_i32 : i32, i32, i32
  }
  func.func @transform_3(%arg0: i32, %arg1: i32) -> (i32, i32) {
    %c0_i32 = arith.constant 0 : i32
    %c0_i32_0 = arith.constant 0 : i32
    return %arg0, %c0_i32 : i32, i32
  }
}

</mosaic_0001>

<bundles_post_ra>
// kernel: tpu_custom_call.1
= control target key start
LH: loop header
LB: loop body
LE: loop exit
PB: predicated region body
PF: predicated region fallthrough
CT: control target
= control target key end

     0   :  { %v116_v2 = vmov 0   ;;  %s169_s0 = inlined_call_operand.vmem [shape: f32[2,8,1], index: 0, kind: input, shape index: {}]   ;;  %s170_s1 = inlined_call_operand.vmem [shape: f32[2,1], index: 1, kind: input, shape index: {}]   ;;  %s171_s2 = inlined_call_operand.vmem [shape: f32[2,8,32], index: 2, kind: input, shape index: {}]   ;;  %s172_s3 = inlined_call_operand.hbm [shape: f32[2,32], index: 3, kind: output, shape index: {}]  }
   0x1   :  { %v21_v0 = vld [vmem:[%s169_s0] sm:$0xff]  ;;  %90 = vset.pattern.permute.xlu0 %v116_v2  ;;  %91 = vset.pattern.permute.xlu1 %v116_v2 }
   0x2   :  { %v65_v1 = vld [vmem:[%s170_s1] sm:$0x3] }
   0x3   :  { %8 = vsyncpa [#allocation4], 0  ;;  %28 = vperm.xlu0 %90, %v21_v0   ;;  %68 = vperm.xlu1 %91, %v65_v1   ;;  %v22_v3 = vld [vmem:[%s169_s0 + $0x8] sm:$0xff]  ;;  %vm19_vm0 = vcmask 254976   ;;  %v117_v4 = vmov 0.0   ;;  %v23_v5 = vld [vmem:[%s171_s2] sm:$0xff] }
   0x4   :  { %20 = vst.msk [vmem:[#allocation2] sm:$0x3] %vm19_vm0, %v117_v4  ;;  %vm38_vm1 = vcmask 261120   ;;  %v24_v8 = vld [vmem:[%s171_s2 + $0x8] sm:$0xff]  ;;  %vm55_vm2 = vcmask 1041409   ;;  %s118_s0 = smov [#allocation3]  }
   0x5   :  { %s79_s2 = sshll.u32 %s118_s0, 4  ;;  %s80_s2 = int_to_ptr.vmem [resolvable:$true] %s79_s2 }
   0x6   :  { %s92_s21 = scalar_lea.vmem %s80_s2, 32  ;;  %p97_p1 = scmp.lt.s32.totalorder %s80_s2, %s80_s2 }
   0x7   :  { %33 = vperm.xlu0 %90, %v22_v3   ;;  %p93_p0 = scmp.ne.s32.totalorder %s80_s2, %s92_s21  ;;  %p98_p2 = scmp.lt.s32.totalorder %s92_s21, %s92_s21 }
   0x9   :  { %p99_p3 = por %p98_p2, %p97_p1 }
   0xb   :  { %v25_v25 = vld [vmem:[#allocation2] sm:$0x3]  ;;  %p100_p4 = pnand %p99_p3, %p93_p0 }
  0x82   :  { %v29_v6 = vpop.permute.xlu0 %28  ;;  %v69_v28 = vpop.permute.xlu1 %68 }
  0x83   :  { %v36_v7 = vmul.f32 %v29_v6, %v23_v5 }
  0x85   :  { %v39_v9 = vsel %vm38_vm1, %v36_v7, 0.0 }
  0x86   :  { %v40_v10 = vrot.slane %v39_v9, 4  ;;  %v34_v11 = vpop.permute.xlu0 %33 }
  0x87   :  { %v37_v12 = vmul.f32 %v34_v11, %v24_v8 }
  0x88   :  { %v41_v13 = vadd.f32 %v40_v10, %v39_v9 }
  0x89   :  { %v46_v14 = vsel %vm38_vm1, %v37_v12, 0.0 }
  0x8a   :  { %v42_v15 = vrot.slane %v41_v13, 2  ;;  %v47_v16 = vrot.slane %v46_v14, 4 }
  0x8c   :  { %v43_v17 = vadd.f32 %v42_v15, %v41_v13  ;;  %v48_v18 = vadd.f32 %v47_v16, %v46_v14 }
  0x8e   :  { %v49_v19 = vrot.slane %v48_v18, 2  ;;  %v44_v20 = vrot.slane %v43_v17, 1 }
  0x90   :  { %v50_v21 = vadd.f32 %v49_v19, %v48_v18  ;;  %v45_v23 = vadd.f32 %v44_v20, %v43_v17 }
  0x92   :  { %v51_v22 = vrot.slane %v50_v21, 1 }
  0x94   :  { %v52_v24 = vadd.f32 %v51_v22, %v50_v21 }
  0x96   :  { %v56_v26 = vsel %vm55_vm2, %v52_v24, %v45_v23 }
  0x97   :  { %v58_v27 = vadd.f32 %v56_v26, %v25_v25 }
  0x99   :  { %60 = vst.msk [vmem:[#allocation2] sm:$0x3] %vm19_vm0, %v58_v27 }
  0xa0   :  { %v64_v29 = vld [vmem:[#allocation2] sm:$0x3] }
  0xa1   :  { %v71_v30 = vmul.f32 %v69_v28, %v64_v29 }
  0xa3   :  { %72 = vst.msk [vmem:[#allocation3] sm:$0x3] %vm19_vm0, %v71_v30 }
  0xa4   :  { %103 = shalt.err (!%p100_p4)
}
  0xa5   :  { %s104_s24 = scalar_lea.hbm %s172_s3, 32 }
  0xa6   :  { %p105_p5 = scmp.ne.s32.totalorder %s172_s3, %s104_s24  ;;  %p108_p6 = scmp.lt.u32.totalorder %s104_s24, %s172_s3 }
  0xa8   :  { %p110_p7 = pnand %p108_p6, %p105_p5 }
  0xaa   :  { %113 = shalt.err (!%p110_p7)
}
  0xab   :  { %82 = dma.vmem_to_hbm [thread:$0]  %s80_s2, 32, %s172_s3, [#allocation4]  }
  0xac   :  { %114 = dma.done.wait [#allocation4], 32  }
  0xad   :  { %115 = vsyncadd [#allocation4], 4294967264 }
  0xae   :  { %86 = vsyncpa [#allocation4], 1 }

</bundles_post_ra>
